<compile_context>
chip_gen: v5e
topology: v5e:2x2
jax: 0.10.0
libtpu: 0.0.40
codegen_flags: <defaults>
</compile_context>

<pallas_src>
import functools

import jax
import jax.numpy as jnp
from jax.experimental import pallas as pl
from jax.experimental.pallas import tpu as pltpu

_EPS = 1e-8  # nn.CosineSimilarity default eps


def _inter_cosine_kernel(f_ref, c_ref, o_ref, *, tile_n, total_n):
    f = f_ref[...].astype(jnp.float32)
    c = c_ref[...].astype(jnp.float32)

    # Row-wise cosine similarity along the feature dim (PyTorch dim=1).
    dot = jnp.sum(f * c, axis=1, keepdims=True)          # [TN, 1]
    ff = jnp.sum(f * f, axis=1, keepdims=True)           # [TN, 1]
    cc = jnp.sum(c * c, axis=1, keepdims=True)           # [TN, 1]
    # max(||f||*||c||, eps) == sqrt(max(ff*cc, eps^2)) since ff, cc >= 0,
    # so fuse the two sqrts + divide into a single EUP rsqrt + VPU mul.
    cos = dot * jax.lax.rsqrt(jnp.maximum(ff * cc, _EPS * _EPS))

    # Mask tail rows of the last (partial) tile.
    row = jax.lax.broadcasted_iota(jnp.int32, (tile_n, 1), 0)
    row = row + pl.program_id(0) * tile_n
    cos = jnp.where(row < total_n, cos, 0.0)

    # Per-tile partial sum, stored lane-dense in this tile's output block.
    partial = jnp.sum(cos)
    o_ref[...] = jnp.full(o_ref.shape, partial, dtype=o_ref.dtype)


def _pick_tile_n(n, d, itemsize, target_block_bytes=6 << 20):
    """Rows per tile: ~6 MiB per input block, sublane-aligned, capped near N."""
    rows = target_block_bytes // max(1, d * itemsize)
    rows -= rows % 8                       # multiple of 8 (sublane alignment)
    rows = max(8, int(rows))
    n_pad = -(-n // 8) * 8                 # N rounded up to a multiple of 8
    return min(rows, n_pad)


def inter_cosine_similarity(feature, centroid):
    """feature, centroid: [N, D]. Returns scalar mean(1 + cos(feature, centroid))."""
    assert feature.shape == centroid.shape
    n, d = feature.shape
    tile_n = _pick_tile_n(n, d, feature.dtype.itemsize)
    num_tiles = pl.cdiv(n, tile_n)

    kernel = functools.partial(_inter_cosine_kernel, tile_n=tile_n, total_n=n)

    partials = pl.pallas_call(
        kernel,
        out_shape=jax.ShapeDtypeStruct((num_tiles, 8, 128), jnp.float32),
        grid_spec=pltpu.PrefetchScalarGridSpec(
            num_scalar_prefetch=0,
            grid=(num_tiles,),
            in_specs=[
                pl.BlockSpec((tile_n, d), lambda i: (i, 0)),
                pl.BlockSpec((tile_n, d), lambda i: (i, 0)),
            ],
            out_specs=pl.BlockSpec((1, 8, 128), lambda i: (i, 0, 0)),
        ),
        compiler_params=pltpu.CompilerParams(
            dimension_semantics=("parallel",),      # independent per-tile partials
            vmem_limit_bytes=48 * 1024 * 1024,      # headroom on v7x's 64 MiB VMEM
        ),
    )(feature, centroid)

    # Tiny final reduction outside the kernel (keeps the grid axis parallel).
    return 1.0 + jnp.sum(partials[:, 0, 0]) / n


def _reference(feature, centroid):
    f = feature.astype(jnp.float32)
    c = centroid.astype(jnp.float32)
    dot = jnp.sum(f * c, axis=1)
    denom = jnp.maximum(
        jnp.linalg.norm(f, axis=1) * jnp.linalg.norm(c, axis=1), _EPS
    )
    return jnp.mean(1.0 + dot / denom, axis=0)


if __name__ == "__main__":
    key = jax.random.PRNGKey(0)
    k1, k2 = jax.random.split(key)
    N, D = 16, 32  # small shapes: 16 rows, 32-dim features
    feature = jax.random.normal(k1, (N, D), dtype=jnp.float32)
    centroid = jax.random.normal(k2, (N, D), dtype=jnp.float32)

    out = inter_cosine_similarity(feature, centroid)
    out = jax.block_until_ready(out)

    ref = _reference(feature, centroid)
    assert jnp.allclose(out, ref, atol=1e-5, rtol=1e-5), (out, ref)
    print("KERNEL_OK")
</pallas_src>

<mosaic_0001>
module attributes {stable_mosaic.version = 11 : i64} {
  func.func @_inter_cosine_kernel(%arg0: i32, %arg1: memref<16x32xf32, #tpu.memory_space<vmem>>, %arg2: memref<16x32xf32, #tpu.memory_space<vmem>>, %arg3: memref<1x8x128xf32, #tpu.memory_space<vmem>>) attributes {dimension_semantics = [#tpu.dimension_semantics<parallel>], iteration_bounds = array<i64: 1>, scalar_prefetch = 0 : i64, scratch_operands = 0 : i64, tpu.core_type = #tpu.core_type<tc>, window_params = [{transform_indices = @transform_0, window_bounds = array<i64: 16, 32>}, {transform_indices = @transform_1, window_bounds = array<i64: 16, 32>}, {transform_indices = @transform_2, window_bounds = array<i64: 1, 8, 128>}]} {
    %c0 = arith.constant 0 : index
    %c0_0 = arith.constant 0 : index
    %0 = vector.load %arg1[%c0, %c0_0] : memref<16x32xf32, #tpu.memory_space<vmem>>, vector<16x32xf32>
    %c0_1 = arith.constant 0 : index
    %c0_2 = arith.constant 0 : index
    %1 = vector.load %arg2[%c0_1, %c0_2] : memref<16x32xf32, #tpu.memory_space<vmem>>, vector<16x32xf32>
    %2 = arith.mulf %0, %1 : vector<16x32xf32>
    %cst = arith.constant dense<0.000000e+00> : vector<16xf32>
    %3 = vector.multi_reduction <add>, %2, %cst [1] : vector<16x32xf32> to vector<16xf32>
    %4 = vector.shape_cast %3 : vector<16xf32> to vector<16x1xf32>
    %5 = arith.mulf %0, %0 : vector<16x32xf32>
    %cst_3 = arith.constant dense<0.000000e+00> : vector<16xf32>
    %6 = vector.multi_reduction <add>, %5, %cst_3 [1] : vector<16x32xf32> to vector<16xf32>
    %7 = vector.shape_cast %6 : vector<16xf32> to vector<16x1xf32>
    %8 = arith.mulf %1, %1 : vector<16x32xf32>
    %cst_4 = arith.constant dense<0.000000e+00> : vector<16xf32>
    %9 = vector.multi_reduction <add>, %8, %cst_4 [1] : vector<16x32xf32> to vector<16xf32>
    %10 = vector.shape_cast %9 : vector<16xf32> to vector<16x1xf32>
    %11 = arith.mulf %7, %10 : vector<16x1xf32>
    %cst_5 = arith.constant 1.000000e-16 : f32
    %12 = vector.broadcast %cst_5 : f32 to vector<16x1xf32>
    %13 = arith.maximumf %11, %12 : vector<16x1xf32>
    %14 = math.rsqrt %13 : vector<16x1xf32>
    %15 = arith.mulf %4, %14 : vector<16x1xf32>
    %16 = tpu.iota {dimensions = array<i32: 0>} : vector<16x1xi32>
    %c16_i32 = arith.constant 16 : i32
    %17 = arith.muli %arg0, %c16_i32 : i32
    %18 = vector.broadcast %17 : i32 to vector<16x1xi32>
    %19 = arith.addi %16, %18 : vector<16x1xi32>
    %c16_i32_6 = arith.constant 16 : i32
    %20 = vector.broadcast %c16_i32_6 : i32 to vector<16x1xi32>
    %21 = arith.cmpi slt, %19, %20 : vector<16x1xi32>
    %cst_7 = arith.constant 0.000000e+00 : f32
    %22 = vector.broadcast %cst_7 : f32 to vector<16x1xf32>
    %23 = arith.select %21, %15, %22 : vector<16x1xi1>, vector<16x1xf32>
    %24 = vector.shape_cast %23 : vector<16x1xf32> to vector<1x16x1xf32>
    %cst_8 = arith.constant dense<0.000000e+00> : vector<1xf32>
    %25 = vector.multi_reduction <add>, %24, %cst_8 [1, 2] : vector<1x16x1xf32> to vector<1xf32>
    %26 = vector.shape_cast %25 : vector<1xf32> to vector<1x1x1xf32>
    %27 = vector.extract %26[0, 0, 0] : f32 from vector<1x1x1xf32>
    %28 = vector.broadcast %27 : f32 to vector<1x8x128xf32>
    %c0_9 = arith.constant 0 : index
    %c0_10 = arith.constant 0 : index
    %c0_11 = arith.constant 0 : index
    %29 = vector.load %arg3[%c0_9, %c0_10, %c0_11] : memref<1x8x128xf32, #tpu.memory_space<vmem>>, vector<1x8x128xf32>
    tpu.vector_store %arg3[%c0_9, %c0_10, %c0_11], %28 {strides = array<i32>} : memref<1x8x128xf32, #tpu.memory_space<vmem>>, vector<1x8x128xf32>,
    return
  }
  func.func @transform_0(%arg0: i32) -> (i32, i32) {
    %c0_i32 = arith.constant 0 : i32
    %c0_i32_0 = arith.constant 0 : i32
    return %arg0, %c0_i32 : i32, i32
  }
  func.func @transform_1(%arg0: i32) -> (i32, i32) {
    %c0_i32 = arith.constant 0 : i32
    %c0_i32_0 = arith.constant 0 : i32
    return %arg0, %c0_i32 : i32, i32
  }
  func.func @transform_2(%arg0: i32) -> (i32, i32, i32) {
    %c0_i32 = arith.constant 0 : i32
    %c0_i32_0 = arith.constant 0 : i32
    %c0_i32_1 = arith.constant 0 : i32
    return %arg0, %c0_i32, %c0_i32_0 : i32, i32, i32
  }
}

</mosaic_0001>

<bundles_post_ra>
// kernel: tpu_custom_call.1
= control target key start
LH: loop header
LB: loop body
LE: loop exit
PB: predicated region body
PF: predicated region fallthrough
CT: control target
= control target key end

     0   :  { %7 = vsyncpa [#allocation3], 0  ;;  %s267_s0 = inlined_call_operand.hbm [shape: f32[16,32], index: 0, kind: input, shape index: {}]   ;;  %s268_s1 = inlined_call_operand.hbm [shape: f32[16,32], index: 1, kind: input, shape index: {}]   ;;  %s269_s2 = inlined_call_operand.hbm [shape: f32[1,8,128], index: 2, kind: output, shape index: {}]  }
   0x1   :  { %8 = vsyncpa [#allocation6], 0 }
   0x2   :  { %9 = vsyncpa [#allocation4], 0  ;;  %s14_s11 = sshll.u32 %s267_s0, 4  ;;  %s232_s12 = smov [#allocation2]   ;;  %s15_s11 = int_to_ptr.hbm [resolvable:$true] %s14_s11 }
   0x3   :  { %s16_s13 = sshll.u32 %s232_s12, 4  ;;  %s27_s16 = sshll.u32 %s268_s1, 4  ;;  %s17_s13 = int_to_ptr.vmem [resolvable:$true] %s16_s13  ;;  %s28_s16 = int_to_ptr.hbm [resolvable:$true] %s27_s16 }
   0x4   :  { %s233_s17 = smov 128   ;;  %s234_s18 = smov 8  }
   0x5   :  { %22 = dma.hbm_to_vmem [thread:$0]  %s15_s11, 256, %s17_s13, [#allocation3], %s233_s17, %s233_s17, %s234_s18  }
   0x6   :  { %s235_s19 = smov [#allocation5]  }
   0x7   :  { %s29_s20 = sshll.u32 %s235_s19, 4  ;;  %s30_s20 = int_to_ptr.vmem [resolvable:$true] %s29_s20 }
   0x8   :  { %35 = dma.hbm_to_vmem [thread:$0]  %s28_s16, 256, %s30_s20, [#allocation6], %s233_s17, %s233_s17, %s234_s18  }
   0x9   :  { %226 = dma.done.wait [#allocation3], 256  }
   0xa   :  { %227 = vsyncadd [#allocation3], 4294967040 }
   0xb   :  { %228 = dma.done.wait [#allocation6], 256  }
   0xc   :  { %229 = vsyncadd [#allocation6], 4294967040  ;;  %v46_v0 = vld [vmem:[#allocation5] sm:$0xff]  ;;  %vm50_vm0 = vcmask 261120   ;;  %v44_v1 = vld [vmem:[#allocation2] sm:$0xff]  ;;  %vm110_vm7 = vcmask 7168  }
   0xd   :  { %v65_v2 = vmul.f32 %v46_v0, %v46_v0  ;;  %v57_v3 = vmul.f32 %v44_v1, %v44_v1  ;;  %v48_v4 = vmul.f32 %v46_v0, %v44_v1  ;;  %v47_v5 = vld [vmem:[#allocation5 + $0x8] sm:$0xff]  ;;  %v45_v6 = vld [vmem:[#allocation2 + $0x8] sm:$0xff]  ;;  %s236_s0 = smov [#allocation7]   ;;  %s132_s23 = sshll.u32 %s269_s2, 4  ;;  %s133_s23 = int_to_ptr.hbm [resolvable:$true] %s132_s23 }
   0xe   :  { %v66_v10 = vmul.f32 %v47_v5, %v47_v5  ;;  %v58_v11 = vmul.f32 %v45_v6, %v45_v6  ;;  %v49_v12 = vmul.f32 %v47_v5, %v45_v6  ;;  %s130_s1 = sshll.u32 %s236_s0, 4  ;;  %s131_s1 = int_to_ptr.vmem [resolvable:$true] %s130_s1 }
   0xf   :  { %v67_v7 = vsel %vm50_vm0, %v65_v2, 0.0  ;;  %v59_v8 = vsel %vm50_vm0, %v57_v3, 0.0  ;;  %v51_v9 = vsel %vm50_vm0, %v48_v4, 0.0 }
  0x10   :  { %68 = vadd.xlane.f32.xlu1 %v67_v7  ;;  %60 = vadd.xlane.f32.xlu0 %v59_v8  ;;  %v70_v13 = vsel %vm50_vm0, %v66_v10, 0.0  ;;  %v62_v14 = vsel %vm50_vm0, %v58_v11, 0.0  ;;  %v54_v15 = vsel %vm50_vm0, %v49_v12, 0.0 }
  0x11   :  { %52 = vadd.xlane.f32.xlu2 %v51_v9 }
  0x18   :  { %71 = vadd.xlane.f32.xlu1 %v70_v13  ;;  %63 = vadd.xlane.f32.xlu0 %v62_v14 }
  0x19   :  { %55 = vadd.xlane.f32.xlu2 %v54_v15 }
  0x83   :  { %v69_v16 = vpop.xlane.xlu1 %68  ;;  %v61_v17 = vpop.xlane.xlu0 %60 }
  0x84   :  { %v73_v18 = vmul.f32 %v69_v16, %v61_v17  ;;  %v53_v29 = vpop.xlane.xlu2 %52 }
  0x86   :  { %v75_v19 = vmax.f32 %v73_v18, 1e-16 }
  0x88   :  { %150 = vrsqrt.f32 %v75_v19  ;;  %vm83_vm2 = vweird.f32 %v75_v19 }
  0x8b   :  { %v72_v20 = vpop.xlane.xlu1 %71  ;;  %v64_v21 = vpop.xlane.xlu0 %63 }
  0x8c   :  { %v74_v22 = vmul.f32 %v72_v20, %v64_v21  ;;  %v56_v38 = vpop.xlane.xlu2 %55 }
  0x8e   :  { %v151_v23 = vpop.eup %150  ;;  %v76_v24 = vmax.f32 %v74_v22, 1e-16 }
  0x8f   :  { %v78_v25 = vmul.f32 %v151_v23, %v75_v19  ;;  %vm84_vm1 = vweird.f32 %v151_v23 }
  0x90   :  { %152 = vrsqrt.f32 %v76_v24  ;;  %vm85_vm3 = vmor %vm83_vm2, %vm84_vm1  ;;  %vm93_vm5 = vweird.f32 %v76_v24 }
  0x91   :  { %v79_v26 = vmul.f32 %v151_v23, %v78_v25 }
  0x93   :  { %v80_v27 = vmul.f32 0.5, %v79_v26 }
  0x95   :  { %v81_v28 = vsub.f32 1.5, %v80_v27 }
  0x96   :  { %v153_v30 = vpop.eup %152 }
  0x97   :  { %v88_v31 = vmul.f32 %v153_v30, %v76_v24  ;;  %v82_v33 = vmul.f32 %v151_v23, %v81_v28  ;;  %vm94_vm4 = vweird.f32 %v153_v30 }
  0x98   :  { %vm95_vm6 = vmor %vm93_vm5, %vm94_vm4 }
  0x99   :  { %v89_v32 = vmul.f32 %v153_v30, %v88_v31  ;;  %v86_v35 = vsel %vm85_vm3, %v151_v23, %v82_v33 }
  0x9a   :  { %v97_v39 = vmul.f32 %v86_v35, %v53_v29 }
  0x9b   :  { %v90_v34 = vmul.f32 0.5, %v89_v32 }
  0x9c   :  { %v111_v42 = vsel %vm110_vm7, %v97_v39, 0.0 }
  0x9d   :  { %v91_v36 = vsub.f32 1.5, %v90_v34 }
  0x9f   :  { %v92_v37 = vmul.f32 %v153_v30, %v91_v36 }
  0xa1   :  { %v96_v40 = vsel %vm95_vm6, %v153_v30, %v92_v37 }
  0xa2   :  { %v98_v41 = vmul.f32 %v96_v40, %v56_v38 }
  0xa4   :  { %v112_v43 = vsel %vm110_vm7, %v98_v41, 0.0 }
  0xa5   :  { %v113_v44 = vadd.f32 %v112_v43, %v111_v42 }
  0xa7   :  { %114 = vadd.xlane.f32.xlu0 %v113_v44 }
 0x11a   :  { %v115_v45 = vpop.xlane.xlu0 %114 }
 0x11b   :  { %v116_v46 = vrot.slane %v115_v45, 4 }
 0x11d   :  { %v117_v47 = vadd.f32 %v116_v46, %v115_v45 }
 0x11f   :  { %v118_v48 = vrot.slane %v117_v47, 2 }
 0x121   :  { %v119_v49 = vadd.f32 %v118_v48, %v117_v47 }
 0x123   :  { %v120_v50 = vrot.slane %v119_v49, 1 }
 0x125   :  { %v121_v51 = vadd.f32 %v120_v50, %v119_v49 }
 0x127   :  { %143 = vpush %v121_v51 }
 0x158   :  { %s144_s24 = spop %143 }
 0x159   :  { %v123_v52 = vstv %s144_s24 }
 0x15a   :  { %124 = vst [vmem:[#allocation7] sm:$0xff] %v123_v52 }
 0x15b   :  { %135 = dma.vmem_to_hbm [thread:$0]  %s131_s1, 128, %s133_s23, [#allocation4]  }
 0x15c   :  { %230 = dma.done.wait [#allocation4], 128  }
 0x15d   :  { %231 = vsyncadd [#allocation4], 4294967168 }
 0x15e   :  { %140 = vsyncpa [#allocation3], 1 }
 0x15f   :  { %141 = vsyncpa [#allocation6], 1 }
 0x160   :  { %142 = vsyncpa [#allocation4], 1 }

</bundles_post_ra>
